<compile_context>
chip_gen: v5e
topology: v5e:2x2
jax: 0.10.0
libtpu: 0.0.40
codegen_flags: <defaults>
</compile_context>

<pallas_src>
import functools

import jax
import jax.numpy as jnp
from jax.experimental import pallas as pl
from jax.experimental.pallas import tpu as pltpu


LANE = 128
SUBLANE = 8


def _round_up(x, m):
    return ((x + m - 1) // m) * m


# ----------------------------- Pallas kernel -----------------------------

def _actor_mlp_kernel(obs_ref, ids_ref,
                      w1o_ref, w1ib_ref,
                      w2_ref, b2_ref,
                      w3_ref, b3_ref,
                      act_ref):
    """Fused ActorNet MLP (concat-free first layer, tanh-bounded actions).

    obs_ref : (TB, obs_dim)        observation tile (Basic_Identical state)
    ids_ref : (TB, n_agents)       one-hot agent ids tile (parameter sharing)
    w1o     : (obs_dim, H1p)       W1 obs half (columns padded to 128)
    w1ib    : (n_agents, H1p)      W1 one-hot half with b1 folded in
    w2, b2  : (H1p, H2p), (1, H2p) padded to 128
    w3, b3  : (H2p, A_pad), (1, A_pad)   padded to 128 lanes
    act_ref : (TB, A_pad)          tanh-bounded actions (lane-dense store)
    """
    # h1 = relu(obs @ W1_obs + onehot @ (W1_ids + b1))   -- concat-free, b1 folded
    h1 = jnp.dot(obs_ref[...], w1o_ref[...], preferred_element_type=jnp.float32)
    h1 = h1 + jnp.dot(ids_ref[...], w1ib_ref[...], preferred_element_type=jnp.float32)
    h1 = jnp.maximum(h1, 0.0)

    h2 = jnp.dot(h1, w2_ref[...], preferred_element_type=jnp.float32) + b2_ref[...]
    h2 = jnp.maximum(h2, 0.0)

    a = jnp.dot(h2, w3_ref[...], preferred_element_type=jnp.float32) + b3_ref[...]
    act_ref[...] = jnp.tanh(a).astype(act_ref.dtype)


# ----------------------------- Parameter preparation (runs ONCE) -----------------------------

def prepare_actor_params(params, obs_dim):
    """Hoisted per-call prep: split W1, fold b1, zero-pad hidden/action dims to 128.

    Returns (prepped_arrays_dict, dim_action).  Semantics-preserving:
      * one-hot rows sum to 1, so ids @ (W1_ids + b1) == ids @ W1_ids + b1.
        NOTE: padded (all-zero one-hot) batch rows therefore do NOT receive b1;
        harmless because those rows are sliced away by the wrapper.
      * padded hidden columns are exactly 0 after ReLU (zero weights, no bias)
        and feed zero rows of the next weight, so they contribute nothing.
      * padded action columns are tanh(0)=0 and sliced off.
    """
    w1, b1 = params["w1"], params["b1"]
    w2, b2 = params["w2"], params["b2"]
    w3, b3 = params["w3"], params["b3"]

    n_agents = w1.shape[0] - obs_dim
    H1, H2, A = w1.shape[1], w2.shape[1], w3.shape[1]
    H1p = _round_up(max(H1, LANE), LANE)
    H2p = _round_up(max(H2, LANE), LANE)
    Ap = _round_up(max(A, LANE), LANE)

    w1o = jnp.zeros((obs_dim, H1p), jnp.float32).at[:, :H1].set(
        w1[:obs_dim].astype(jnp.float32))
    w1ib = jnp.zeros((n_agents, H1p), jnp.float32).at[:, :H1].set(
        (w1[obs_dim:] + b1).astype(jnp.float32))

    w2p = jnp.zeros((H1p, H2p), jnp.float32).at[:H1, :H2].set(w2.astype(jnp.float32))
    b2p = jnp.zeros((1, H2p), jnp.float32).at[:, :H2].set(b2.astype(jnp.float32))

    w3p = jnp.zeros((H2p, Ap), jnp.float32).at[:H2, :A].set(w3.astype(jnp.float32))
    b3p = jnp.zeros((1, Ap), jnp.float32).at[:, :A].set(b3.astype(jnp.float32))

    prepped = {"w1o": w1o, "w1ib": w1ib, "w2": w2p, "b2": b2p, "w3": w3p, "b3": b3p}
    return prepped, int(A)


# ----------------------------- Wrapper -----------------------------

@functools.partial(jax.jit, static_argnames=("dim_action", "block_batch"))
def independent_ddpg_forward(observation, agent_onehot, prepped, *,
                             dim_action, block_batch=None):
    """Pallas-backed Independent_DDPG_Policy.forward for one model key.

    observation : (B, obs_dim)   float32  -- Basic_Identical representation
    agent_onehot: (B, n_agents)  float32  -- agent_ids (parameter sharing)
    prepped     : dict from prepare_actor_params (pre-split / pre-padded)
    block_batch : None -> whole batch in one tile (grid=(1,), best for
                  single-TC v5e/v6e and small B).  For large B on v7x pass
                  ~B/2 so both TensorCores get equal tiles.

    Returns actions (B, dim_action) float32 in (-1, 1).
    """
    obs = observation
    ids = agent_onehot
    B, obs_dim = obs.shape
    n_agents = ids.shape[1]
    A_pad = prepped["w3"].shape[1]

    # --- batch tiling: default = one big sublane-aligned tile (grid=(1,)).
    if block_batch is None:
        TB = min(_round_up(B, SUBLANE), 2048)
    else:
        TB = _round_up(min(block_batch, _round_up(B, SUBLANE)), SUBLANE)
    B_pad = _round_up(B, TB)
    if B_pad != B:
        obs = jnp.pad(obs, ((0, B_pad - B), (0, 0)))
        ids = jnp.pad(ids, ((0, B_pad - B), (0, 0)))

    grid = (B_pad // TB,)

    actions_padded = pl.pallas_call(
        _actor_mlp_kernel,
        out_shape=jax.ShapeDtypeStruct((B_pad, A_pad), jnp.float32),
        grid=grid,
        in_specs=[
            # activations: tiled over the batch axis
            pl.BlockSpec((TB, obs_dim), lambda i: (i, 0)),
            pl.BlockSpec((TB, n_agents), lambda i: (i, 0)),
            # weights / biases: constant block index -> VMEM-resident across steps
            pl.BlockSpec(prepped["w1o"].shape, lambda i: (0, 0)),
            pl.BlockSpec(prepped["w1ib"].shape, lambda i: (0, 0)),
            pl.BlockSpec(prepped["w2"].shape, lambda i: (0, 0)),
            pl.BlockSpec(prepped["b2"].shape, lambda i: (0, 0)),
            pl.BlockSpec(prepped["w3"].shape, lambda i: (0, 0)),
            pl.BlockSpec(prepped["b3"].shape, lambda i: (0, 0)),
        ],
        out_specs=pl.BlockSpec((TB, A_pad), lambda i: (i, 0)),
        compiler_params=pltpu.CompilerParams(
            # batch axis may shard across v7x's two TCs when grid > 1
            dimension_semantics=("parallel",),
            # VMEM is never a constraint here (<1 MiB); budget is just a safe cap.
            vmem_limit_bytes=32 * 1024 * 1024,
        ),
    )(obs, ids,
      prepped["w1o"], prepped["w1ib"],
      prepped["w2"], prepped["b2"],
      prepped["w3"], prepped["b3"])

    return actions_padded[:B, :dim_action]


def policy_forward(observation_dict, agent_ids, prepped_dict, dim_action_dict,
                   rnn_hidden=None):
    """Mirrors Independent_DDPG_Policy.forward: returns (rnn_hidden_new, actions)."""
    # TODO(synk): RNN/LSTM hidden-state path (use_rnn=True) not implemented here.
    # TODO(synk): non-shared multi-key ModuleDict loop collapses to the single
    #             shared key "agent" in this parameter-sharing config.
    actions = {
        key: independent_ddpg_forward(observation_dict[key], agent_ids,
                                      prepped_dict[key],
                                      dim_action=dim_action_dict[key])
        for key in observation_dict
    }
    return rnn_hidden, actions


# ----------------------------- Parameter init -----------------------------

def init_actor_params(key, dim_in, hidden, dim_action):
    dims = [dim_in] + list(hidden) + [dim_action]
    params = {}
    keys = jax.random.split(key, len(dims) - 1)
    for i, (d_in, d_out) in enumerate(zip(dims[:-1], dims[1:]), start=1):
        kw, kb = jax.random.split(keys[i - 1])
        bound = 1.0 / jnp.sqrt(d_in)
        params[f"w{i}"] = jax.random.uniform(kw, (d_in, d_out), jnp.float32, -bound, bound)
        params[f"b{i}"] = jax.random.uniform(kb, (1, d_out), jnp.float32, -bound, bound)
    return params


# ----------------------------- Reference (plain JAX) -----------------------------

def reference_forward(observation, agent_onehot, params):
    x = jnp.concatenate([observation, agent_onehot], axis=-1)
    h1 = jnp.maximum(x @ params["w1"] + params["b1"], 0.0)
    h2 = jnp.maximum(h1 @ params["w2"] + params["b2"], 0.0)
    return jnp.tanh(h2 @ params["w3"] + params["b3"])


# ----------------------------- Main -----------------------------

if __name__ == "__main__":
    # Small shapes consistent with the module's forward:
    #   n_agents=2, env batch=64 -> stacked batch B=128 (parameter sharing),
    #   obs_dim=16, actor_hidden_size=[64, 64], Box action dim=4.
    n_agents = 2
    env_batch = 64
    B = n_agents * env_batch
    obs_dim = 16
    hidden = (64, 64)
    dim_action = 4
    dim_actor_in = obs_dim + n_agents  # state dim + n_agents (parameter sharing)

    root = jax.random.PRNGKey(0)
    k_obs, k_par = jax.random.split(root)

    observation = jax.random.normal(k_obs, (B, obs_dim), jnp.float32)
    # agent_ids as one-hot, repeated over the env batch (as xuance runners do).
    agent_onehot = jnp.tile(jnp.eye(n_agents, dtype=jnp.float32), (env_batch, 1))

    params = init_actor_params(k_par, dim_actor_in, hidden, dim_action)

    # One-time parameter preparation (hoisted out of the per-call jit path).
    prepped, A = prepare_actor_params(params, obs_dim)
    prepped = jax.tree_util.tree_map(jax.block_until_ready, prepped)

    rnn_hidden_new, actions = policy_forward(
        {"agent": observation}, agent_onehot, {"agent": prepped}, {"agent": A},
        rnn_hidden=None)
    act = actions["agent"]
    jax.block_until_ready(act)

    ref = reference_forward(observation, agent_onehot, params)
    assert rnn_hidden_new is None
    assert act.shape == (B, dim_action) and act.dtype == jnp.float32
    assert jnp.allclose(act, ref, atol=1e-4, rtol=1e-4)

    print("KERNEL_OK")
</pallas_src>

<mosaic_0001>
module attributes {stable_mosaic.version = 11 : i64} {
  func.func @_actor_mlp_kernel(%arg0: i32, %arg1: memref<128x16xf32, #tpu.memory_space<vmem>>, %arg2: memref<128x2xf32, #tpu.memory_space<vmem>>, %arg3: memref<16x128xf32, #tpu.memory_space<vmem>>, %arg4: memref<2x128xf32, #tpu.memory_space<vmem>>, %arg5: memref<128x128xf32, #tpu.memory_space<vmem>>, %arg6: memref<1x128xf32, #tpu.memory_space<vmem>>, %arg7: memref<128x128xf32, #tpu.memory_space<vmem>>, %arg8: memref<1x128xf32, #tpu.memory_space<vmem>>, %arg9: memref<128x128xf32, #tpu.memory_space<vmem>>) attributes {dimension_semantics = [#tpu.dimension_semantics<parallel>], iteration_bounds = array<i64: 1>, scalar_prefetch = 0 : i64, scratch_operands = 0 : i64, tpu.core_type = #tpu.core_type<tc>, window_params = [{transform_indices = @transform_0, window_bounds = array<i64: 128, 16>}, {transform_indices = @transform_1, window_bounds = array<i64: 128, 2>}, {pipeline_mode = #tpu.pipeline_mode<synchronous>, transform_indices = @transform_2, window_bounds = array<i64: 16, 128>}, {pipeline_mode = #tpu.pipeline_mode<synchronous>, transform_indices = @transform_3, window_bounds = array<i64: 2, 128>}, {pipeline_mode = #tpu.pipeline_mode<synchronous>, transform_indices = @transform_4, window_bounds = array<i64: 128, 128>}, {pipeline_mode = #tpu.pipeline_mode<synchronous>, transform_indices = @transform_5, window_bounds = array<i64: 1, 128>}, {pipeline_mode = #tpu.pipeline_mode<synchronous>, transform_indices = @transform_6, window_bounds = array<i64: 128, 128>}, {pipeline_mode = #tpu.pipeline_mode<synchronous>, transform_indices = @transform_7, window_bounds = array<i64: 1, 128>}, {transform_indices = @transform_8, window_bounds = array<i64: 128, 128>}]} {
    %c0 = arith.constant 0 : index
    %c0_0 = arith.constant 0 : index
    %0 = vector.load %arg1[%c0, %c0_0] : memref<128x16xf32, #tpu.memory_space<vmem>>, vector<128x16xf32>
    %c0_1 = arith.constant 0 : index
    %c0_2 = arith.constant 0 : index
    %1 = vector.load %arg3[%c0_1, %c0_2] : memref<16x128xf32, #tpu.memory_space<vmem>>, vector<16x128xf32>
    %cst = arith.constant dense<0.000000e+00> : vector<128x128xf32>
    %2 = tpu.matmul %0, %1, %cst {dimension_numbers = #tpu.dot_dimension_numbers<[1], [0], [0], [1], [0, 0, 1, 1], [], []>} : vector<128x16xf32>, vector<16x128xf32>, vector<128x128xf32> -> vector<128x128xf32>
    %c0_3 = arith.constant 0 : index
    %c0_4 = arith.constant 0 : index
    %3 = vector.load %arg2[%c0_3, %c0_4] : memref<128x2xf32, #tpu.memory_space<vmem>>, vector<128x2xf32>
    %c0_5 = arith.constant 0 : index
    %c0_6 = arith.constant 0 : index
    %4 = vector.load %arg4[%c0_5, %c0_6] : memref<2x128xf32, #tpu.memory_space<vmem>>, vector<2x128xf32>
    %cst_7 = arith.constant dense<0.000000e+00> : vector<128x128xf32>
    %5 = tpu.matmul %3, %4, %cst_7 {dimension_numbers = #tpu.dot_dimension_numbers<[1], [0], [0], [1], [0, 0, 1, 1], [], []>} : vector<128x2xf32>, vector<2x128xf32>, vector<128x128xf32> -> vector<128x128xf32>
    %6 = arith.addf %2, %5 : vector<128x128xf32>
    %cst_8 = arith.constant 0.000000e+00 : f32
    %7 = vector.broadcast %cst_8 : f32 to vector<128x128xf32>
    %8 = arith.maximumf %6, %7 : vector<128x128xf32>
    %c0_9 = arith.constant 0 : index
    %c0_10 = arith.constant 0 : index
    %9 = vector.load %arg5[%c0_9, %c0_10] : memref<128x128xf32, #tpu.memory_space<vmem>>, vector<128x128xf32>
    %cst_11 = arith.constant dense<0.000000e+00> : vector<128x128xf32>
    %10 = tpu.matmul %8, %9, %cst_11 {dimension_numbers = #tpu.dot_dimension_numbers<[1], [0], [0], [1], [0, 0, 1, 1], [], []>} : vector<128x128xf32>, vector<128x128xf32>, vector<128x128xf32> -> vector<128x128xf32>
    %c0_12 = arith.constant 0 : index
    %c0_13 = arith.constant 0 : index
    %11 = vector.load %arg6[%c0_12, %c0_13] : memref<1x128xf32, #tpu.memory_space<vmem>>, vector<1x128xf32>
    %12 = vector.broadcast %11 : vector<1x128xf32> to vector<128x128xf32>
    %13 = arith.addf %10, %12 : vector<128x128xf32>
    %cst_14 = arith.constant 0.000000e+00 : f32
    %14 = vector.broadcast %cst_14 : f32 to vector<128x128xf32>
    %15 = arith.maximumf %13, %14 : vector<128x128xf32>
    %c0_15 = arith.constant 0 : index
    %c0_16 = arith.constant 0 : index
    %16 = vector.load %arg7[%c0_15, %c0_16] : memref<128x128xf32, #tpu.memory_space<vmem>>, vector<128x128xf32>
    %cst_17 = arith.constant dense<0.000000e+00> : vector<128x128xf32>
    %17 = tpu.matmul %15, %16, %cst_17 {dimension_numbers = #tpu.dot_dimension_numbers<[1], [0], [0], [1], [0, 0, 1, 1], [], []>} : vector<128x128xf32>, vector<128x128xf32>, vector<128x128xf32> -> vector<128x128xf32>
    %c0_18 = arith.constant 0 : index
    %c0_19 = arith.constant 0 : index
    %18 = vector.load %arg8[%c0_18, %c0_19] : memref<1x128xf32, #tpu.memory_space<vmem>>, vector<1x128xf32>
    %19 = vector.broadcast %18 : vector<1x128xf32> to vector<128x128xf32>
    %20 = arith.addf %17, %19 : vector<128x128xf32>
    %21 = math.tanh %20 : vector<128x128xf32>
    %c0_20 = arith.constant 0 : index
    %c0_21 = arith.constant 0 : index
    %22 = vector.load %arg9[%c0_20, %c0_21] : memref<128x128xf32, #tpu.memory_space<vmem>>, vector<128x128xf32>
    tpu.vector_store %arg9[%c0_20, %c0_21], %21 {strides = array<i32>} : memref<128x128xf32, #tpu.memory_space<vmem>>, vector<128x128xf32>,
    return
  }
  func.func @transform_0(%arg0: i32) -> (i32, i32) {
    %c0_i32 = arith.constant 0 : i32
    %c0_i32_0 = arith.constant 0 : i32
    return %arg0, %c0_i32 : i32, i32
  }
  func.func @transform_1(%arg0: i32) -> (i32, i32) {
    %c0_i32 = arith.constant 0 : i32
    %c0_i32_0 = arith.constant 0 : i32
    return %arg0, %c0_i32 : i32, i32
  }
  func.func @transform_2(%arg0: i32) -> (i32, i32) {
    %c0_i32 = arith.constant 0 : i32
    %c0_i32_0 = arith.constant 0 : i32
    %c0_i32_1 = arith.constant 0 : i32
    return %c0_i32, %c0_i32_0 : i32, i32
  }
  func.func @transform_3(%arg0: i32) -> (i32, i32) {
    %c0_i32 = arith.constant 0 : i32
    %c0_i32_0 = arith.constant 0 : i32
    %c0_i32_1 = arith.constant 0 : i32
    return %c0_i32, %c0_i32_0 : i32, i32
  }
  func.func @transform_4(%arg0: i32) -> (i32, i32) {
    %c0_i32 = arith.constant 0 : i32
    %c0_i32_0 = arith.constant 0 : i32
    %c0_i32_1 = arith.constant 0 : i32
    return %c0_i32, %c0_i32_0 : i32, i32
  }
  func.func @transform_5(%arg0: i32) -> (i32, i32) {
    %c0_i32 = arith.constant 0 : i32
    %c0_i32_0 = arith.constant 0 : i32
    %c0_i32_1 = arith.constant 0 : i32
    return %c0_i32, %c0_i32_0 : i32, i32
  }
  func.func @transform_6(%arg0: i32) -> (i32, i32) {
    %c0_i32 = arith.constant 0 : i32
    %c0_i32_0 = arith.constant 0 : i32
    %c0_i32_1 = arith.constant 0 : i32
    return %c0_i32, %c0_i32_0 : i32, i32
  }
  func.func @transform_7(%arg0: i32) -> (i32, i32) {
    %c0_i32 = arith.constant 0 : i32
    %c0_i32_0 = arith.constant 0 : i32
    %c0_i32_1 = arith.constant 0 : i32
    return %c0_i32, %c0_i32_0 : i32, i32
  }
  func.func @transform_8(%arg0: i32) -> (i32, i32) {
    %c0_i32 = arith.constant 0 : i32
    %c0_i32_0 = arith.constant 0 : i32
    return %arg0, %c0_i32 : i32, i32
  }
}

</mosaic_0001>

<bundles_post_ra>
// kernel: independent_ddpg_forward.1
= control target key start
LH: loop header
LB: loop body
LE: loop exit
PB: predicated region body
PF: predicated region fallthrough
CT: control target
= control target key end

     0   :  { %13 = vsyncpa [#allocation3], 0  ;;  %s1069_s0 = inlined_call_operand.vmem [shape: f32[128,16], index: 0, kind: input, shape index: {}]   ;;  %s1070_s1 = inlined_call_operand.vmem [shape: f32[128,2], index: 1, kind: input, shape index: {}]   ;;  %s1071_s2 = inlined_call_operand.vmem [shape: f32[16,128], index: 2, kind: input, shape index: {}]   ;;  %s1072_s3 = inlined_call_operand.vmem [shape: f32[2,128], index: 3, kind: input, shape index: {}]   ;;  %s1073_s4 = inlined_call_operand.vmem [shape: f32[128,128], index: 4, kind: input, shape index: {}]   ;;  %s1074_s5 = inlined_call_operand.hbm [shape: f32[1,128], index: 5, kind: input, shape index: {}]   ;;  %s1075_s6 = inlined_call_operand.vmem [shape: f32[128,128], index: 6, kind: input, shape index: {}]   ;;  %s1076_s7 = inlined_call_operand.hbm [shape: f32[1,128], index: 7, kind: input, shape index: {}]   ;;  %s1077_s8 = inlined_call_operand.vmem [shape: f32[128,128], index: 8, kind: output, shape index: {}]  }
   0x1   :  { %s30_s29 = sshll.u32 %s1074_s5, 4  ;;  %s31_s29 = int_to_ptr.hbm [resolvable:$true] %s30_s29 }
   0x2   :  { %14 = vsyncpa [#allocation5], 0  ;;  %s717_s30 = smov [#allocation2]   ;;  %s43_s12 = sshll.u32 %s1076_s7, 4  ;;  %s44_s12 = int_to_ptr.hbm [resolvable:$true] %s43_s12 }
   0x3   :  { %s32_s9 = sshll.u32 %s717_s30, 4  ;;  %s718_s13 = smov [#allocation4]   ;;  %s33_s9 = int_to_ptr.vmem [resolvable:$true] %s32_s9 }
   0x4   :  { %35 = dma.hbm_to_vmem [thread:$0]  %s31_s29, 16, %s33_s9, [#allocation3]  }
   0x5   :  { %s45_s14 = sshll.u32 %s718_s13, 4  ;;  %s46_s14 = int_to_ptr.vmem [resolvable:$true] %s45_s14 }
   0x6   :  { %48 = dma.hbm_to_vmem [thread:$0]  %s44_s12, 16, %s46_s14, [#allocation5]  }
   0x7   :  { %713 = dma.done.wait [#allocation3], 16  }
   0x8   :  { %714 = vsyncadd [#allocation3], 4294967280 }
   0x9   :  { %715 = dma.done.wait [#allocation5], 16  }
   0xa   :  { %716 = vsyncadd [#allocation5], 4294967280  ;;  %vm141_vm0 = vcmask 1041408   ;;  %vm92_vm1 = vcmask 15360   ;;  %v74_v0 = vld [vmem:[%s1071_s2 + $0x8] sm:$0xff]  ;;  %v73_v2 = vld [vmem:[%s1071_s2] sm:$0xff] }
   0xb   :  { %v91_v1 = vld [vmem:[%s1072_s3] sm:$0x3]  ;;  %273 = vmatpush.msra.mxu1 %v74_v0  ;;  %vm210_vm2 = vcmask 130048   ;;  %v76_v5 = vld [vmem:[%s1070_s1 + $0x8] sm:$0xff]  ;;  %v77_v7 = vld [vmem:[%s1070_s1 + $0x10] sm:$0xff] }
   0xc   :  { %564 = vmatpush.msk.msra.mxu0 %vm141_vm0, %v91_v1  ;;  %v75_v3 = vld [vmem:[%s1070_s1] sm:$0xff]  ;;  %v58_v6 = vld [vmem:[%s1069_s0 + $0x8] sm:$0xff]  ;;  %v59_v8 = vld [vmem:[%s1069_s0 + $0x10] sm:$0xff] }
   0xd   :  { %v57_v4 = vld [vmem:[%s1069_s0] sm:$0xff]  ;;  %565 = vmatmul.msk.f32.vlgmr.msra.gmra.mxu0 %vm92_vm1, %v75_v3  ;;  %274 = vmatpush.msra.mxu1 %v73_v2  ;;  %v78_v9 = vld [vmem:[%s1070_s1 + $0x18] sm:$0xff]  ;;  %v80_v13 = vld [vmem:[%s1070_s1 + $0x28] sm:$0xff] }
   0xe   :  { %581 = vmatmul.msk.f32.vlgmr.msra.gmra.mxu1 %vm210_vm2, %v57_v4  ;;  %v60_v10 = vld [vmem:[%s1069_s0 + $0x18] sm:$0xff]  ;;  %v79_v11 = vld [vmem:[%s1070_s1 + $0x20] sm:$0xff]  ;;  %v62_v14 = vld [vmem:[%s1069_s0 + $0x28] sm:$0xff] }
   0xf   :  { %v61_v12 = vld [vmem:[%s1069_s0 + $0x20] sm:$0xff]  ;;  %v81_v15 = vld [vmem:[%s1070_s1 + $0x30] sm:$0xff]  ;;  %v82_v17 = vld [vmem:[%s1070_s1 + $0x38] sm:$0xff] }
  0x10   :  { %v63_v16 = vld [vmem:[%s1069_s0 + $0x30] sm:$0xff]  ;;  %v64_v18 = vld [vmem:[%s1069_s0 + $0x38] sm:$0xff]  ;;  %v83_v19 = vld [vmem:[%s1070_s1 + $0x40] sm:$0xff] }
  0x11   :  { %v65_v20 = vld [vmem:[%s1069_s0 + $0x40] sm:$0xff]  ;;  %v355_v21 = vld [vmem:[%s1073_s4 + $0x78] sm:$0xff]  ;;  %v354_v22 = vld [vmem:[%s1073_s4 + $0x70] sm:$0xff] }
  0x12   :  { %360 = vmatpush.msrb.mxu0 %v355_v21  ;;  %597 = vmatpush.msra.mxu2 %v355_v21  ;;  %v353_v23 = vld [vmem:[%s1073_s4 + $0x68] sm:$0xff]  ;;  %v352_v26 = vld [vmem:[%s1073_s4 + $0x60] sm:$0xff]  ;;  %v351_v27 = vld [vmem:[%s1073_s4 + $0x58] sm:$0xff] }
  0x13   :  { %v84_v24 = vld [vmem:[%s1070_s1 + $0x48] sm:$0xff]  ;;  %v350_v28 = vld [vmem:[%s1073_s4 + $0x50] sm:$0xff]  ;;  %v348_v32 = vld [vmem:[%s1073_s4 + $0x40] sm:$0xff] }
  0x14   :  { %361 = vmatpush.msrb.mxu0 %v354_v22  ;;  %598 = vmatpush.msra.mxu2 %v354_v22  ;;  %v66_v25 = vld [vmem:[%s1069_s0 + $0x48] sm:$0xff]  ;;  %v85_v29 = vld [vmem:[%s1070_s1 + $0x50] sm:$0xff]  ;;  %v347_v33 = vld [vmem:[%s1073_s4 + $0x38] sm:$0xff] }
  0x15   :  { %566 = vmatmul.msk.f32.gmra.mxu0 %vm92_vm1, %v76_v5  ;;  %v349_v30 = vld [vmem:[%s1073_s4 + $0x48] sm:$0xff]  ;;  %v67_v31 = vld [vmem:[%s1069_s0 + $0x50] sm:$0xff]  ;;  %v86_v35 = vld [vmem:[%s1070_s1 + $0x58] sm:$0xff] }
  0x16   :  { %582 = vmatmul.msk.f32.gmra.mxu1 %vm210_vm2, %v58_v6  ;;  %362 = vmatpush.msrb.mxu0 %v353_v23  ;;  %v346_v34 = vld [vmem:[%s1073_s4 + $0x30] sm:$0xff]  ;;  %v345_v36 = vld [vmem:[%s1073_s4 + $0x28] sm:$0xff]  ;;  %v68_v37 = vld [vmem:[%s1069_s0 + $0x58] sm:$0xff] }
  0x17   :  { %599 = vmatpush.msra.mxu2 %v353_v23  ;;  %v344_v38 = vld [vmem:[%s1073_s4 + $0x20] sm:$0xff]  ;;  %v343_v39 = vld [vmem:[%s1073_s4 + $0x18] sm:$0xff]  ;;  %v342_v41 = vld [vmem:[%s1073_s4 + $0x10] sm:$0xff] }
  0x18   :  { %363 = vmatpush.msrb.mxu0 %v352_v26  ;;  %v87_v40 = vld [vmem:[%s1070_s1 + $0x60] sm:$0xff]  ;;  %v341_v43 = vld [vmem:[%s1073_s4 + $0x8] sm:$0xff]  ;;  %v89_v47 = vld [vmem:[%s1070_s1 + $0x70] sm:$0xff] }
  0x19   :  { %600 = vmatpush.msra.mxu2 %v352_v26  ;;  %v69_v42 = vld [vmem:[%s1069_s0 + $0x60] sm:$0xff]  ;;  %v88_v45 = vld [vmem:[%s1070_s1 + $0x68] sm:$0xff]  ;;  %v71_v48 = vld [vmem:[%s1069_s0 + $0x70] sm:$0xff] }
  0x1a   :  { %364 = vmatpush.msrb.mxu0 %v351_v27  ;;  %v340_v44 = vld [vmem:[%s1073_s4] sm:$0xff]  ;;  %v70_v46 = vld [vmem:[%s1069_s0 + $0x68] sm:$0xff]  ;;  %v90_v49 = vld [vmem:[%s1070_s1 + $0x78] sm:$0xff] }
  0x1b   :  { %601 = vmatpush.msra.mxu2 %v351_v27  ;;  %v72_v50 = vld [vmem:[%s1069_s0 + $0x78] sm:$0xff]  ;;  %v455_v27 = vld [vmem:[%s1075_s6 + $0x70] sm:$0xff] }
  0x1c   :  { %365 = vmatpush.msrb.mxu0 %v350_v28 }
  0x1d   :  { %567 = vmatmul.msk.f32.gmra.mxu0 %vm92_vm1, %v77_v7  ;;  %602 = vmatpush.msra.mxu2 %v350_v28 }
  0x1e   :  { %583 = vmatmul.msk.f32.gmra.mxu1 %vm210_vm2, %v59_v8  ;;  %366 = vmatpush.msrb.mxu0 %v349_v30 }
  0x1f   :  { %603 = vmatpush.msra.mxu2 %v349_v30  ;;  %v453_v30 = vld [vmem:[%s1075_s6 + $0x60] sm:$0xff] }
  0x20   :  { %367 = vmatpush.msrb.mxu0 %v348_v32 }
  0x21   :  { %604 = vmatpush.msra.mxu2 %v348_v32  ;;  %v452_v32 = vld [vmem:[%s1075_s6 + $0x58] sm:$0xff] }
  0x22   :  { %368 = vmatpush.msrb.mxu0 %v347_v33 }
  0x23   :  { %605 = vmatpush.msra.mxu2 %v347_v33 }
  0x24   :  { %369 = vmatpush.msrb.mxu0 %v346_v34 }
  0x25   :  { %568 = vmatmul.msk.f32.gmra.mxu0 %vm92_vm1, %v78_v9  ;;  %606 = vmatpush.msra.mxu2 %v346_v34 }
  0x26   :  { %584 = vmatmul.msk.f32.gmra.mxu1 %vm210_vm2, %v60_v10  ;;  %370 = vmatpush.msrb.mxu0 %v345_v36 }
  0x27   :  { %607 = vmatpush.msra.mxu2 %v345_v36 }
  0x28   :  { %371 = vmatpush.msrb.mxu0 %v344_v38 }
  0x29   :  { %608 = vmatpush.msra.mxu2 %v344_v38  ;;  %v449_v38 = vld [vmem:[%s1075_s6 + $0x40] sm:$0xff] }
  0x2a   :  { %372 = vmatpush.msrb.mxu0 %v343_v39 }
  0x2b   :  { %609 = vmatpush.msra.mxu2 %v343_v39 }
  0x2c   :  { %373 = vmatpush.msrb.mxu0 %v342_v41 }
  0x2d   :  { %569 = vmatmul.msk.f32.gmra.mxu0 %vm92_vm1, %v79_v11  ;;  %610 = vmatpush.msra.mxu2 %v342_v41 }
  0x2e   :  { %585 = vmatmul.msk.f32.gmra.mxu1 %vm210_vm2, %v61_v12  ;;  %374 = vmatpush.msrb.mxu0 %v341_v43 }
  0x2f   :  { %611 = vmatpush.msra.mxu2 %v341_v43  ;;  %v447_v43 = vld [vmem:[%s1075_s6 + $0x30] sm:$0xff] }
  0x30   :  { %375 = vmatpush.msrb.mxu0 %v340_v44 }
  0x31   :  { %612 = vmatpush.msra.mxu2 %v340_v44 }
  0x35   :  { %570 = vmatmul.msk.f32.gmra.mxu0 %vm92_vm1, %v80_v13 }
  0x36   :  { %586 = vmatmul.msk.f32.gmra.mxu1 %vm210_vm2, %v62_v14 }
  0x3d   :  { %571 = vmatmul.msk.f32.gmra.mxu0 %vm92_vm1, %v81_v15 }
  0x3e   :  { %587 = vmatmul.msk.f32.gmra.mxu1 %vm210_vm2, %v63_v16 }
  0x45   :  { %572 = vmatmul.msk.f32.gmra.mxu0 %vm92_vm1, %v82_v17 }
  0x46   :  { %588 = vmatmul.msk.f32.gmra.mxu1 %vm210_vm2, %v64_v18 }
  0x4d   :  { %573 = vmatmul.msk.f32.gmra.mxu0 %vm92_vm1, %v83_v19 }
  0x4e   :  { %589 = vmatmul.msk.f32.gmra.mxu1 %vm210_vm2, %v65_v20 }
  0x55   :  { %574 = vmatmul.msk.f32.gmra.mxu0 %vm92_vm1, %v84_v24  ;;  %v456_v24 = vld [vmem:[%s1075_s6 + $0x78] sm:$0xff] }
  0x56   :  { %590 = vmatmul.msk.f32.gmra.mxu1 %vm210_vm2, %v66_v25  ;;  %613 = vmatpush.msra.mxu3 %v456_v24 }
  0x57   :  { %461 = vmatpush.msrb.mxu1 %v456_v24 }
  0x58   :  { %614 = vmatpush.msra.mxu3 %v455_v27 }
  0x59   :  { %462 = vmatpush.msrb.mxu1 %v455_v27 }
  0x5d   :  { %575 = vmatmul.msk.f32.gmra.mxu0 %vm92_vm1, %v85_v29  ;;  %v454_v29 = vld [vmem:[%s1075_s6 + $0x68] sm:$0xff] }
  0x5e   :  { %591 = vmatmul.msk.f32.gmra.mxu1 %vm210_vm2, %v67_v31  ;;  %615 = vmatpush.msra.mxu3 %v454_v29 }
  0x5f   :  { %463 = vmatpush.msrb.mxu1 %v454_v29 }
  0x60   :  { %616 = vmatpush.msra.mxu3 %v453_v30 }
  0x61   :  { %464 = vmatpush.msrb.mxu1 %v453_v30 }
  0x62   :  { %617 = vmatpush.msra.mxu3 %v452_v32 }
  0x63   :  { %465 = vmatpush.msrb.mxu1 %v452_v32 }
  0x65   :  { %576 = vmatmul.msk.f32.gmra.mxu0 %vm92_vm1, %v86_v35  ;;  %v451_v35 = vld [vmem:[%s1075_s6 + $0x50] sm:$0xff] }
  0x66   :  { %592 = vmatmul.msk.f32.gmra.mxu1 %vm210_vm2, %v68_v37  ;;  %618 = vmatpush.msra.mxu3 %v451_v35  ;;  %v450_v37 = vld [vmem:[%s1075_s6 + $0x48] sm:$0xff] }
  0x67   :  { %466 = vmatpush.msrb.mxu1 %v451_v35 }
  0x68   :  { %619 = vmatpush.msra.mxu3 %v450_v37 }
  0x69   :  { %467 = vmatpush.msrb.mxu1 %v450_v37 }
  0x6a   :  { %620 = vmatpush.msra.mxu3 %v449_v38 }
  0x6b   :  { %468 = vmatpush.msrb.mxu1 %v449_v38 }
  0x6d   :  { %577 = vmatmul.msk.f32.gmra.mxu0 %vm92_vm1, %v87_v40  ;;  %v448_v40 = vld [vmem:[%s1075_s6 + $0x38] sm:$0xff] }
  0x6e   :  { %593 = vmatmul.msk.f32.gmra.mxu1 %vm210_vm2, %v69_v42  ;;  %621 = vmatpush.msra.mxu3 %v448_v40 }
  0x6f   :  { %469 = vmatpush.msrb.mxu1 %v448_v40 }
  0x70   :  { %622 = vmatpush.msra.mxu3 %v447_v43 }
  0x71   :  { %470 = vmatpush.msrb.mxu1 %v447_v43 }
  0x75   :  { %578 = vmatmul.msk.f32.gmra.mxu0 %vm92_vm1, %v88_v45  ;;  %v446_v45 = vld [vmem:[%s1075_s6 + $0x28] sm:$0xff] }
  0x76   :  { %594 = vmatmul.msk.f32.gmra.mxu1 %vm210_vm2, %v70_v46  ;;  %623 = vmatpush.msra.mxu3 %v446_v45  ;;  %v445_v46 = vld [vmem:[%s1075_s6 + $0x20] sm:$0xff] }
  0x77   :  { %471 = vmatpush.msrb.mxu1 %v446_v45 }
  0x78   :  { %624 = vmatpush.msra.mxu3 %v445_v46 }
  0x79   :  { %472 = vmatpush.msrb.mxu1 %v445_v46 }
  0x7d   :  { %579 = vmatmul.msk.f32.gmra.mxu0 %vm92_vm1, %v89_v47  ;;  %v444_v47 = vld [vmem:[%s1075_s6 + $0x18] sm:$0xff] }
  0x7e   :  { %595 = vmatmul.msk.f32.gmra.mxu1 %vm210_vm2, %v71_v48  ;;  %625 = vmatpush.msra.mxu3 %v444_v47 }
  0x7f   :  { %473 = vmatpush.msrb.mxu1 %v444_v47 }
  0x85   :  { %580 = vmatmul.msk.f32.gmra.mxu0 %vm92_vm1, %v90_v49 }
  0x86   :  { %596 = vmatmul.msk.f32.gmra.mxu1 %vm210_vm2, %v72_v50 }
  0x8a   :  { %v162_v51 = vpop.f32.mrf.mxu0 }
  0x8b   :  { %v276_v52 = vpop.f32.mrf.mxu1 }
  0x8c   :  { %v277_v53 = vadd.f32 %v276_v52, %v162_v51  ;;  %v443_v51 = vld [vmem:[%s1075_s6 + $0x10] sm:$0xff] }
  0x8d   :  { %474 = vmatpush.msrb.mxu1 %v443_v51  ;;  %626 = vmatpush.msra.mxu3 %v443_v51  ;;  %v1003_v51 = vld [vmem:[#allocation4] ss:$0 sm:$0xff] }
  0x8e   :  { %v324_v54 = vmax.f32 %v277_v53, 0.0  ;;  %v442_v53 = vld [vmem:[%s1075_s6 + $0x8] sm:$0xff] }
  0x8f   :  { %475 = vmatpush.msrb.mxu1 %v442_v53  ;;  %627 = vmatpush.msra.mxu3 %v442_v53 }
  0x90   :  { %376 = vmatmul.f32.vlgmr.msrb.gmra.mxu0 %v324_v54  ;;  %v441_v54 = vld [vmem:[%s1075_s6] sm:$0xff] }
  0x91   :  { %476 = vmatpush.msrb.mxu1 %v441_v54  ;;  %628 = vmatpush.msra.mxu3 %v441_v54 }
  0x92   :  { %v165_v55 = vpop.f32.mrf.mxu0 }
  0x93   :  { %v279_v56 = vpop.f32.mrf.mxu1 }
  0x94   :  { %v280_v57 = vadd.f32 %v279_v56, %v165_v55 }
  0x96   :  { %v325_v58 = vmax.f32 %v280_v57, 0.0 }
  0x98   :  { %379 = vmatmul.f32.vlgmr.msra.gmra.mxu2 %v325_v58 }
  0x9a   :  { %v168_v59 = vpop.f32.mrf.mxu0 }
  0x9b   :  { %v282_v60 = vpop.f32.mrf.mxu1 }
  0x9c   :  { %v283_v61 = vadd.f32 %v282_v60, %v168_v59 }
  0x9e   :  { %v326_v62 = vmax.f32 %v283_v61, 0.0 }
  0xa0   :  { %382 = vmatmul.f32.gmra.mxu2 %v326_v62 }
  0xa2   :  { %v171_v63 = vpop.f32.mrf.mxu0 }
  0xa3   :  { %v285_v0 = vpop.f32.mrf.mxu1 }
  0xa4   :  { %v286_v1 = vadd.f32 %v285_v0, %v171_v63 }
  0xa6   :  { %v327_v2 = vmax.f32 %v286_v1, 0.0 }
  0xa8   :  { %385 = vmatmul.f32.gmra.mxu2 %v327_v2 }
  0xaa   :  { %v174_v3 = vpop.f32.mrf.mxu0 }
  0xab   :  { %v288_v4 = vpop.f32.mrf.mxu1 }
  0xac   :  { %v289_v5 = vadd.f32 %v288_v4, %v174_v3  ;;  %v631_v3 = vld [vmem:[#allocation2] ss:$0 sm:$0xff] }
  0xae   :  { %v328_v6 = vmax.f32 %v289_v5, 0.0 }
  0xb0   :  { %388 = vmatmul.f32.gmra.mxu2 %v328_v6 }
  0xb2   :  { %v177_v7 = vpop.f32.mrf.mxu0 }
  0xb3   :  { %v291_v8 = vpop.f32.mrf.mxu1 }
  0xb4   :  { %v292_v9 = vadd.f32 %v291_v8, %v177_v7 }
  0xb6   :  { %v329_v10 = vmax.f32 %v292_v9, 0.0 }
  0xb8   :  { %391 = vmatmul.f32.gmra.mxu2 %v329_v10 }
  0xba   :  { %v180_v11 = vpop.f32.mrf.mxu0 }
  0xbb   :  { %v294_v12 = vpop.f32.mrf.mxu1 }
  0xbc   :  { %v295_v13 = vadd.f32 %v294_v12, %v180_v11 }
  0xbe   :  { %v330_v14 = vmax.f32 %v295_v13, 0.0 }
  0xc0   :  { %394 = vmatmul.f32.gmra.mxu2 %v330_v14 }
  0xc2   :  { %v183_v15 = vpop.f32.mrf.mxu0 }
  0xc3   :  { %v297_v16 = vpop.f32.mrf.mxu1 }
  0xc4   :  { %v298_v17 = vadd.f32 %v297_v16, %v183_v15 }
  0xc6   :  { %v331_v18 = vmax.f32 %v298_v17, 0.0 }
  0xc8   :  { %397 = vmatmul.f32.gmra.mxu2 %v331_v18 }
  0xca   :  { %v186_v19 = vpop.f32.mrf.mxu0 }
  0xcb   :  { %v300_v20 = vpop.f32.mrf.mxu1 }
  0xcc   :  { %v301_v21 = vadd.f32 %v300_v20, %v186_v19 }
  0xce   :  { %v332_v22 = vmax.f32 %v301_v21, 0.0 }
  0xd0   :  { %400 = vmatmul.f32.gmra.mxu2 %v332_v22 }
  0xd2   :  { %v189_v23 = vpop.f32.mrf.mxu0 }
  0xd3   :  { %v303_v25 = vpop.f32.mrf.mxu1 }
  0xd4   :  { %v304_v26 = vadd.f32 %v303_v25, %v189_v23 }
  0xd6   :  { %v333_v28 = vmax.f32 %v304_v26, 0.0 }
  0xd8   :  { %403 = vmatmul.f32.gmra.mxu2 %v333_v28 }
  0xda   :  { %v192_v31 = vpop.f32.mrf.mxu0 }
  0xdb   :  { %v306_v33 = vpop.f32.mrf.mxu1 }
  0xdc   :  { %v307_v34 = vadd.f32 %v306_v33, %v192_v31 }
  0xde   :  { %v334_v36 = vmax.f32 %v307_v34, 0.0 }
  0xe0   :  { %406 = vmatmul.f32.gmra.mxu2 %v334_v36 }
  0xe2   :  { %v195_v39 = vpop.f32.mrf.mxu0 }
  0xe3   :  { %v309_v41 = vpop.f32.mrf.mxu1 }
  0xe4   :  { %v310_v42 = vadd.f32 %v309_v41, %v195_v39 }
  0xe6   :  { %v335_v44 = vmax.f32 %v310_v42, 0.0 }
  0xe8   :  { %409 = vmatmul.f32.gmra.mxu2 %v335_v44 }
  0xea   :  { %v198_v48 = vpop.f32.mrf.mxu0 }
  0xeb   :  { %v312_v49 = vpop.f32.mrf.mxu1 }
  0xec   :  { %v313_v50 = vadd.f32 %v312_v49, %v198_v48 }
  0xee   :  { %v336_v52 = vmax.f32 %v313_v50, 0.0 }
  0xf0   :  { %412 = vmatmul.f32.gmra.mxu2 %v336_v52 }
  0xf2   :  { %v201_v55 = vpop.f32.mrf.mxu0 }
  0xf3   :  { %v315_v56 = vpop.f32.mrf.mxu1 }
  0xf4   :  { %v316_v57 = vadd.f32 %v315_v56, %v201_v55 }
  0xf6   :  { %v337_v58 = vmax.f32 %v316_v57, 0.0 }
  0xf8   :  { %415 = vmatmul.f32.gmra.mxu2 %v337_v58 }
  0xfa   :  { %v204_v59 = vpop.f32.mrf.mxu0 }
  0xfb   :  { %v318_v60 = vpop.f32.mrf.mxu1 }
  0xfc   :  { %v319_v61 = vadd.f32 %v318_v60, %v204_v59 }
  0xfe   :  { %v338_v62 = vmax.f32 %v319_v61, 0.0 }
 0x100   :  { %418 = vmatmul.f32.gmra.mxu2 %v338_v62 }
 0x102   :  { %v207_v63 = vpop.f32.mrf.mxu0 }
 0x103   :  { %v321_v0 = vpop.f32.mrf.mxu1 }
 0x104   :  { %v322_v1 = vadd.f32 %v321_v0, %v207_v63 }
 0x106   :  { %v339_v2 = vmax.f32 %v322_v1, 0.0 }
 0x108   :  { %421 = vmatmul.f32.gmra.mxu2 %v339_v2 }
 0x10d   :  { %v377_v4 = vpop.f32.mrf.mxu0 }
 0x10e   :  { %v378_v5 = vadd.f32 %v631_v3, %v377_v4 }
 0x110   :  { %v425_v6 = vmax.f32 %v378_v5, 0.0 }
 0x112   :  { %477 = vmatmul.f32.vlgmr.msrb.gmra.mxu1 %v425_v6 }
 0x11b   :  { %v380_v7 = vpop.f32.mrf.mxu2 }
 0x11c   :  { %v381_v8 = vadd.f32 %v631_v3, %v380_v7 }
 0x11e   :  { %v426_v9 = vmax.f32 %v381_v8, 0.0 }
 0x120   :  { %480 = vmatmul.f32.vlgmr.msra.gmra.mxu3 %v426_v9 }
 0x123   :  { %v383_v10 = vpop.f32.mrf.mxu2 }
 0x124   :  { %v384_v11 = vadd.f32 %v631_v3, %v383_v10 }
 0x126   :  { %v427_v12 = vmax.f32 %v384_v11, 0.0 }
 0x128   :  { %483 = vmatmul.f32.gmra.mxu3 %v427_v12 }
 0x12b   :  { %v386_v13 = vpop.f32.mrf.mxu2 }
 0x12c   :  { %v387_v14 = vadd.f32 %v631_v3, %v386_v13 }
 0x12e   :  { %v428_v15 = vmax.f32 %v387_v14, 0.0 }
 0x130   :  { %486 = vmatmul.f32.gmra.mxu3 %v428_v15 }
 0x133   :  { %v389_v16 = vpop.f32.mrf.mxu2 }
 0x134   :  { %v390_v17 = vadd.f32 %v631_v3, %v389_v16 }
 0x136   :  { %v429_v18 = vmax.f32 %v390_v17, 0.0 }
 0x138   :  { %489 = vmatmul.f32.gmra.mxu3 %v429_v18 }
 0x13b   :  { %v392_v19 = vpop.f32.mrf.mxu2 }
 0x13c   :  { %v393_v20 = vadd.f32 %v631_v3, %v392_v19 }
 0x13e   :  { %v430_v21 = vmax.f32 %v393_v20, 0.0 }
 0x140   :  { %492 = vmatmul.f32.gmra.mxu3 %v430_v21 }
 0x143   :  { %v395_v22 = vpop.f32.mrf.mxu2 }
 0x144   :  { %v396_v23 = vadd.f32 %v631_v3, %v395_v22 }
 0x146   :  { %v431_v24 = vmax.f32 %v396_v23, 0.0 }
 0x148   :  { %495 = vmatmul.f32.gmra.mxu3 %v431_v24 }
 0x14b   :  { %v398_v25 = vpop.f32.mrf.mxu2 }
 0x14c   :  { %v399_v26 = vadd.f32 %v631_v3, %v398_v25 }
 0x14e   :  { %v432_v27 = vmax.f32 %v399_v26, 0.0 }
 0x150   :  { %498 = vmatmul.f32.gmra.mxu3 %v432_v27 }
 0x153   :  { %v401_v28 = vpop.f32.mrf.mxu2 }
 0x154   :  { %v402_v29 = vadd.f32 %v631_v3, %v401_v28 }
 0x156   :  { %v433_v30 = vmax.f32 %v402_v29, 0.0 }
 0x158   :  { %501 = vmatmul.f32.gmra.mxu3 %v433_v30 }
 0x15b   :  { %v404_v31 = vpop.f32.mrf.mxu2 }
 0x15c   :  { %v405_v32 = vadd.f32 %v631_v3, %v404_v31 }
 0x15e   :  { %v434_v33 = vmax.f32 %v405_v32, 0.0 }
 0x160   :  { %504 = vmatmul.f32.gmra.mxu3 %v434_v33 }
 0x163   :  { %v407_v34 = vpop.f32.mrf.mxu2 }
 0x164   :  { %v408_v35 = vadd.f32 %v631_v3, %v407_v34 }
 0x166   :  { %v435_v36 = vmax.f32 %v408_v35, 0.0 }
 0x168   :  { %507 = vmatmul.f32.gmra.mxu3 %v435_v36 }
 0x16b   :  { %v410_v37 = vpop.f32.mrf.mxu2 }
 0x16c   :  { %v411_v38 = vadd.f32 %v631_v3, %v410_v37 }
 0x16e   :  { %v436_v39 = vmax.f32 %v411_v38, 0.0 }
 0x170   :  { %510 = vmatmul.f32.gmra.mxu3 %v436_v39 }
 0x173   :  { %v413_v40 = vpop.f32.mrf.mxu2 }
 0x174   :  { %v414_v41 = vadd.f32 %v631_v3, %v413_v40 }
 0x176   :  { %v437_v42 = vmax.f32 %v414_v41, 0.0 }
 0x178   :  { %513 = vmatmul.f32.gmra.mxu3 %v437_v42 }
 0x17b   :  { %v416_v43 = vpop.f32.mrf.mxu2 }
 0x17c   :  { %v417_v44 = vadd.f32 %v631_v3, %v416_v43 }
 0x17e   :  { %v438_v45 = vmax.f32 %v417_v44, 0.0 }
 0x180   :  { %516 = vmatmul.f32.gmra.mxu3 %v438_v45 }
 0x183   :  { %v419_v46 = vpop.f32.mrf.mxu2 }
 0x184   :  { %v420_v47 = vadd.f32 %v631_v3, %v419_v46 }
 0x186   :  { %v439_v48 = vmax.f32 %v420_v47, 0.0 }
 0x188   :  { %519 = vmatmul.f32.gmra.mxu3 %v439_v48 }
 0x18b   :  { %v422_v49 = vpop.f32.mrf.mxu2 }
 0x18c   :  { %v423_v50 = vadd.f32 %v631_v3, %v422_v49 }
 0x18e   :  { %v440_v52 = vmax.f32 %v423_v50, 0.0 }
 0x18f   :  { %v478_v53 = vpop.f32.mrf.mxu1 }
 0x190   :  { %v479_v54 = vadd.f32 %v1003_v51, %v478_v53  ;;  %522 = vmatmul.f32.gmra.mxu3 %v440_v52 }
 0x192   :  { %633 = vtanh.f32 %v479_v54 }
 0x198   :  { %v634_v55 = vpop.eup %633 }
 0x199   :  { %542 = vst [vmem:[%s1077_s8] sm:$0xff] %v634_v55 }
 0x1a3   :  { %v481_v56 = vpop.f32.mrf.mxu3 }
 0x1a4   :  { %v482_v57 = vadd.f32 %v1003_v51, %v481_v56 }
 0x1a6   :  { %635 = vtanh.f32 %v482_v57 }
 0x1ab   :  { %v484_v58 = vpop.f32.mrf.mxu3 }
 0x1ac   :  { %v636_v59 = vpop.eup %635  ;;  %v485_v60 = vadd.f32 %v1003_v51, %v484_v58 }
 0x1ad   :  { %543 = vst [vmem:[%s1077_s8 + $0x8] sm:$0xff] %v636_v59 }
 0x1ae   :  { %637 = vtanh.f32 %v485_v60 }
 0x1b3   :  { %v487_v61 = vpop.f32.mrf.mxu3 }
 0x1b4   :  { %v638_v62 = vpop.eup %637  ;;  %v488_v63 = vadd.f32 %v1003_v51, %v487_v61 }
 0x1b5   :  { %544 = vst [vmem:[%s1077_s8 + $0x10] sm:$0xff] %v638_v62 }
 0x1b6   :  { %639 = vtanh.f32 %v488_v63 }
 0x1bb   :  { %v490_v0 = vpop.f32.mrf.mxu3 }
 0x1bc   :  { %v640_v1 = vpop.eup %639  ;;  %v491_v2 = vadd.f32 %v1003_v51, %v490_v0 }
 0x1bd   :  { %545 = vst [vmem:[%s1077_s8 + $0x18] sm:$0xff] %v640_v1 }
 0x1be   :  { %641 = vtanh.f32 %v491_v2 }
 0x1c3   :  { %v493_v3 = vpop.f32.mrf.mxu3 }
 0x1c4   :  { %v642_v4 = vpop.eup %641  ;;  %v494_v5 = vadd.f32 %v1003_v51, %v493_v3 }
 0x1c5   :  { %546 = vst [vmem:[%s1077_s8 + $0x20] sm:$0xff] %v642_v4 }
 0x1c6   :  { %643 = vtanh.f32 %v494_v5 }
 0x1cb   :  { %v496_v6 = vpop.f32.mrf.mxu3 }
 0x1cc   :  { %v644_v7 = vpop.eup %643  ;;  %v497_v8 = vadd.f32 %v1003_v51, %v496_v6 }
 0x1cd   :  { %547 = vst [vmem:[%s1077_s8 + $0x28] sm:$0xff] %v644_v7 }
 0x1ce   :  { %645 = vtanh.f32 %v497_v8 }
 0x1d3   :  { %v499_v9 = vpop.f32.mrf.mxu3 }
 0x1d4   :  { %v646_v10 = vpop.eup %645  ;;  %v500_v11 = vadd.f32 %v1003_v51, %v499_v9 }
 0x1d5   :  { %548 = vst [vmem:[%s1077_s8 + $0x30] sm:$0xff] %v646_v10 }
 0x1d6   :  { %647 = vtanh.f32 %v500_v11 }
 0x1db   :  { %v502_v12 = vpop.f32.mrf.mxu3 }
 0x1dc   :  { %v648_v13 = vpop.eup %647  ;;  %v503_v14 = vadd.f32 %v1003_v51, %v502_v12 }
 0x1dd   :  { %549 = vst [vmem:[%s1077_s8 + $0x38] sm:$0xff] %v648_v13 }
 0x1de   :  { %649 = vtanh.f32 %v503_v14 }
 0x1e3   :  { %v505_v15 = vpop.f32.mrf.mxu3 }
 0x1e4   :  { %v650_v16 = vpop.eup %649  ;;  %v506_v17 = vadd.f32 %v1003_v51, %v505_v15 }
 0x1e5   :  { %550 = vst [vmem:[%s1077_s8 + $0x40] sm:$0xff] %v650_v16 }
 0x1e6   :  { %651 = vtanh.f32 %v506_v17 }
 0x1eb   :  { %v508_v18 = vpop.f32.mrf.mxu3 }
 0x1ec   :  { %v652_v19 = vpop.eup %651  ;;  %v509_v20 = vadd.f32 %v1003_v51, %v508_v18 }
 0x1ed   :  { %551 = vst [vmem:[%s1077_s8 + $0x48] sm:$0xff] %v652_v19 }
 0x1ee   :  { %653 = vtanh.f32 %v509_v20 }
 0x1f3   :  { %v511_v21 = vpop.f32.mrf.mxu3 }
 0x1f4   :  { %v654_v22 = vpop.eup %653  ;;  %v512_v23 = vadd.f32 %v1003_v51, %v511_v21 }
 0x1f5   :  { %552 = vst [vmem:[%s1077_s8 + $0x50] sm:$0xff] %v654_v22 }
 0x1f6   :  { %655 = vtanh.f32 %v512_v23 }
 0x1fb   :  { %v514_v24 = vpop.f32.mrf.mxu3 }
 0x1fc   :  { %v656_v25 = vpop.eup %655  ;;  %v515_v26 = vadd.f32 %v1003_v51, %v514_v24 }
 0x1fd   :  { %553 = vst [vmem:[%s1077_s8 + $0x58] sm:$0xff] %v656_v25 }
 0x1fe   :  { %657 = vtanh.f32 %v515_v26 }
 0x203   :  { %v517_v27 = vpop.f32.mrf.mxu3 }
 0x204   :  { %v658_v28 = vpop.eup %657  ;;  %v518_v29 = vadd.f32 %v1003_v51, %v517_v27 }
 0x205   :  { %554 = vst [vmem:[%s1077_s8 + $0x60] sm:$0xff] %v658_v28 }
 0x206   :  { %659 = vtanh.f32 %v518_v29 }
 0x20b   :  { %v520_v30 = vpop.f32.mrf.mxu3 }
 0x20c   :  { %v660_v31 = vpop.eup %659  ;;  %v521_v32 = vadd.f32 %v1003_v51, %v520_v30 }
 0x20d   :  { %555 = vst [vmem:[%s1077_s8 + $0x68] sm:$0xff] %v660_v31 }
 0x20e   :  { %661 = vtanh.f32 %v521_v32 }
 0x213   :  { %v523_v33 = vpop.f32.mrf.mxu3 }
 0x214   :  { %v662_v34 = vpop.eup %661  ;;  %v524_v35 = vadd.f32 %v1003_v51, %v523_v33 }
 0x215   :  { %556 = vst [vmem:[%s1077_s8 + $0x70] sm:$0xff] %v662_v34 }
 0x216   :  { %663 = vtanh.f32 %v524_v35 }
 0x21c   :  { %v664_v36 = vpop.eup %663 }
 0x21d   :  { %557 = vst [vmem:[%s1077_s8 + $0x78] sm:$0xff] %v664_v36 }
 0x21e   :  { %562 = vsyncpa [#allocation3], 1 }
 0x21f   :  { %563 = vsyncpa [#allocation5], 1 }

</bundles_post_ra>
